<compile_context>
chip_gen: v7x
topology: tpu7x:2x2x1
jax: 0.10.0
libtpu: 0.0.40
codegen_flags: <defaults>
</compile_context>

<pallas_src>
import math

import jax
import jax.numpy as jnp
from jax.experimental import pallas as pl
from jax.experimental.pallas import tpu as pltpu


# --------------------------------------------------------------------------- #
# Kernel
# --------------------------------------------------------------------------- #
def _grid_sample_kernel(x_ref, wy_ref, wxt_ref, o_ref):
    # x_ref  : (1, c_blk, h, w)    original (unpadded) channel block, compute dtype
    # wy_ref : (1, h, h)           fused bilinear taps along height (h_out, h_in)
    # wxt_ref: (1, w, h)           fused bilinear taps along width  (w_in, h_out)
    # o_ref  : (1, 1, h, c_blk*h)  lane-dense output slab, layout (i, (c, j))
    _, cb, h_in, w_in = x_ref.shape
    h_out = wy_ref.shape[1]

    # Width contraction with channels stacked on M: one MXU matmul
    # (c_blk*h, w) @ (w, h_out).  No operand upcast: bf16 goes straight to the
    # MXU, accumulation is f32.
    xs = x_ref[0].reshape(cb * h_in, w_in)
    t = jnp.dot(xs, wxt_ref[0], preferred_element_type=jnp.float32)     # (cb*h, h_out)
    t = t.astype(x_ref.dtype)

    # Move channels next to the output-width axis so the height contraction is
    # also a single stacked matmul with a lane-dense N = c_blk*h_out.
    t = pltpu.einshape("cpj->pcj", t.reshape(cb, h_in, h_out))          # (h_in, cb, h_out)
    t = t.reshape(h_in, cb * h_out)
    out = jnp.dot(wy_ref[0], t, preferred_element_type=jnp.float32)     # (h_out, cb*h_out)
    o_ref[0, 0] = out.astype(o_ref.dtype)


# --------------------------------------------------------------------------- #
# Fused bilinear tap matrices (replicate pad + zeros padding folded in)
# --------------------------------------------------------------------------- #
def _fused_taps(coords, h_in, pad):
    """coords: (n, h_out) pixel coords in the replicate-padded image of size
    h_in + 2*pad -> (n, h_out, h_in) bilinear tap weights against the ORIGINAL
    (unpadded) image.  Taps outside the padded image get weight 0
    (== grid_sample padding_mode='zeros'); taps inside it are mapped back to
    the original image by clamping (== F.pad 'replicate')."""
    hp = h_in + 2 * pad
    p0 = jnp.floor(coords)
    w1 = coords - p0
    w0 = 1.0 - w1
    p0i = p0.astype(jnp.int32)
    p1i = p0i + 1
    v0 = (p0i >= 0) & (p0i < hp)
    v1 = (p1i >= 0) & (p1i < hp)
    q0 = jnp.clip(p0i - pad, 0, h_in - 1)
    q1 = jnp.clip(p1i - pad, 0, h_in - 1)
    idx = jnp.arange(h_in, dtype=jnp.int32)[None, None, :]
    tap0 = ((idx == q0[..., None]) & v0[..., None]).astype(jnp.float32)
    tap1 = ((idx == q1[..., None]) & v1[..., None]).astype(jnp.float32)
    return w0[..., None] * tap0 + w1[..., None] * tap1


def _fused_taps_t(coords, h_in, pad):
    """Same taps, built directly in (n, h_in, h_out) orientation (no transpose)."""
    hp = h_in + 2 * pad
    p0 = jnp.floor(coords)
    w1 = coords - p0
    w0 = 1.0 - w1
    p0i = p0.astype(jnp.int32)
    p1i = p0i + 1
    v0 = (p0i >= 0) & (p0i < hp)
    v1 = (p1i >= 0) & (p1i < hp)
    q0 = jnp.clip(p0i - pad, 0, h_in - 1)
    q1 = jnp.clip(p1i - pad, 0, h_in - 1)
    idx = jnp.arange(h_in, dtype=jnp.int32)[None, :, None]               # (1, h_in, 1)
    tap0 = ((idx == q0[:, None, :]) & v0[:, None, :]).astype(jnp.float32)
    tap1 = ((idx == q1[:, None, :]) & v1[:, None, :]).astype(jnp.float32)
    return w0[:, None, :] * tap0 + w1[:, None, :] * tap1


# --------------------------------------------------------------------------- #
# VMEM accounting & channel blocking
# --------------------------------------------------------------------------- #
def _round_up(v, t):
    return ((v + t - 1) // t) * t


def _sublane_tile(itemsize):
    return {1: 32, 2: 16, 4: 8}.get(itemsize, 8)


def _block_vmem_bytes(cb, h, w, ci, oi, n_buf_x=2):
    """True per-step VMEM footprint: 128-lane + packed-sublane padding on every
    pipelined buffer (double-buffered), plus the in-kernel f32 intermediate,
    its dtype-cast/einshape copies, and the f32 out tile."""
    lane = 128
    sc, so = _sublane_tile(ci), _sublane_tile(oi)
    x_blk = n_buf_x * cb * _round_up(h, sc) * _round_up(w, lane) * ci
    wy_blk = 2 * _round_up(h, sc) * _round_up(h, lane) * ci
    wx_blk = 2 * _round_up(w, sc) * _round_up(h, lane) * ci
    o_blk = 2 * _round_up(h, so) * _round_up(cb * h, lane) * oi
    t_f32 = _round_up(cb * h, 8) * _round_up(h, lane) * 4
    t_cast = _round_up(cb * h, sc) * _round_up(h, lane) * ci
    t_esh = _round_up(h, sc) * _round_up(cb * h, lane) * ci
    o_f32 = _round_up(h, 8) * _round_up(cb * h, lane) * 4
    return x_blk + wy_blk + wx_blk + o_blk + t_f32 + t_cast + t_esh + o_f32


def _vmem_budget():
    """(per-step block budget, vmem_limit_bytes) -- generation aware."""
    cap = 64 << 20                      # conservative fallback ~ v7x (64 MiB / TC)
    try:
        cap = int(pltpu.get_tpu_info().vmem_capacity_bytes)
    except Exception:
        pass
    if cap >= (100 << 20):              # v5e / v6e: 128 MiB VMEM
        return 32 << 20, 64 << 20
    return 14 << 20, 40 << 20           # v7x-class or unknown: stay conservative


def _choose_channel_blocking(c, h, w, ci, oi, budget_bytes, max_pad_frac=0.25):
    """Pick (c_blk, c_padded). Prefer a lane-dense output slab (c_blk*h multiple
    of 128) when it needs only modest channel zero-padding; otherwise fall back
    to the largest divisor of c whose true footprint fits the budget."""
    def fits(cb):
        return _block_vmem_bytes(cb, h, w, ci, oi) <= budget_bytes

    m = 128 // math.gcd(h, 128)         # smallest cb with (cb*h) % 128 == 0
    for k in range(pl.cdiv(c, m), 0, -1):
        cb = k * m
        c_pad = _round_up(c, cb)
        if (c_pad - c) <= max(0, int(max_pad_frac * c)) and fits(cb):
            return cb, c_pad
    for cb in range(c, 0, -1):
        if c % cb == 0 and fits(cb):
            return cb, c
    return 1, c


# --------------------------------------------------------------------------- #
# Shift sampling + tap construction (cheap elementwise glue, plain JAX)
# --------------------------------------------------------------------------- #
def _prepare(x, mean, var, key, pad, act, compute_dtype):
    n, c, h, w = x.shape
    assert h == w
    hp = h + 2 * pad

    eps = 1.0 / hp
    arange = jnp.linspace(-1.0 + eps, 1.0 - eps, hp, dtype=jnp.float32)[:h]   # (h,)
    smax = 2.0 * (2 * pad + 1) / hp

    mean_c = jnp.clip(mean.astype(jnp.float32), 1e-6, smax)
    # NOTE: torch.distributions.Normal(mean, var) treats `var` as the SCALE
    # (std); the module passes it straight through, so we match that exactly.
    var_c = jnp.clip(var.astype(jnp.float32), 1e-6, None)

    if act:
        shift = jnp.clip(mean_c, 0.0, smax)                          # dist.mean, clamped
        total_shift = jnp.broadcast_to(shift[None, :], (n, 2))
    else:
        k1, k2 = jax.random.split(key)
        z = jax.random.normal(k1, (2,), dtype=jnp.float32)           # dist.rsample()
        shift = jnp.clip(mean_c + var_c * z, 0.0, smax)              # clamp before noise
        noise = 0.0075 * jax.random.normal(k2, (n, 2), dtype=jnp.float32)
        total_shift = shift[None, :] + noise

    # Normalized -> pixel coords for align_corners=False: pix = ((g + 1)*hp - 1)/2
    gx = arange[None, :] + total_shift[:, 0:1]                       # (n, h) width
    gy = arange[None, :] + total_shift[:, 1:2]                       # (n, h) height
    ix = ((gx + 1.0) * hp - 1.0) * 0.5
    iy = ((gy + 1.0) * hp - 1.0) * 0.5

    wy = _fused_taps(iy, h, pad).astype(compute_dtype)               # (n, h, h)
    wxt = _fused_taps_t(ix, w, pad).astype(compute_dtype)            # (n, w, h)
    return wy, wxt


# --------------------------------------------------------------------------- #
# Public entry point
# --------------------------------------------------------------------------- #
def auto_shifts_aug(x, mean, var, key, pad, act=False, ratio=0.2,
                    compute_dtype=None, slab_output=False):
    """JAX/Pallas port of AutoShiftsAug.forward. mean/var have shape (2,) = (x, y).

    ratio is unused in the module's forward (kept for signature parity).
    compute_dtype defaults to bf16 when x is f32 (f32 accumulation in the MXU).
    slab_output=True returns the lane-dense (n, n_cb, h, c_blk, h) slab and
    skips the wrapper-side NCHW transpose (saves a full output re-read/write).
    """
    n, c, h, w = x.shape
    out_dtype = x.dtype
    if compute_dtype is None:
        compute_dtype = jnp.bfloat16 if out_dtype == jnp.float32 else out_dtype
    ci = jnp.dtype(compute_dtype).itemsize
    oi = jnp.dtype(out_dtype).itemsize

    wy, wxt = _prepare(x, mean, var, key, pad, act, compute_dtype)
    x_c = x.astype(compute_dtype)

    block_budget, vmem_limit = _vmem_budget()
    c_blk, c_pad = _choose_channel_blocking(c, h, w, ci, oi, block_budget)
    if c_pad > c:
        # Zero channel padding only when it buys an output lane width that is a
        # multiple of 128 at modest cost; padded channels are sliced away below.
        x_c = jnp.pad(x_c, ((0, 0), (0, c_pad - c), (0, 0), (0, 0)))
    n_cb = c_pad // c_blk

    flops = 2 * n * c_pad * h * h * (w + h)
    bytes_accessed = ci * (x_c.size + wy.size + wxt.size) + oi * n * c_pad * h * h

    out_k = pl.pallas_call(
        _grid_sample_kernel,
        out_shape=jax.ShapeDtypeStruct((n, n_cb, h, c_blk * h), out_dtype),
        grid=(n, n_cb),
        in_specs=[
            # NOTE: if profiling shows exposed DMA on the x block, request
            # pipeline_mode=pl.Buffered(3) here; the corrected footprint model
            # above leaves headroom on v5e/v6e (re-check on v7x first).
            pl.BlockSpec((1, c_blk, h, w), lambda b, cb: (b, cb, 0, 0)),
            pl.BlockSpec((1, h, h), lambda b, cb: (b, 0, 0)),
            pl.BlockSpec((1, w, h), lambda b, cb: (b, 0, 0)),
        ],
        out_specs=pl.BlockSpec((1, 1, h, c_blk * h), lambda b, cb: (b, cb, 0, 0)),
        compiler_params=pltpu.CompilerParams(
            dimension_semantics=("parallel", "parallel"),
            vmem_limit_bytes=vmem_limit),
        cost_estimate=pl.CostEstimate(
            flops=flops, transcendentals=0, bytes_accessed=bytes_accessed),
    )(x_c, wy, wxt)

    if slab_output:
        return out_k.reshape(n, n_cb, h, c_blk, h)

    # Lane-dense slab (n, n_cb, h, c_blk*h) -> NCHW (n, c, h, h); layout
    # plumbing stays in the XLA wrapper (module semantics want NCHW).
    out = out_k.reshape(n, n_cb, h, c_blk, h)
    out = jnp.transpose(out, (0, 1, 3, 2, 4)).reshape(n, c_pad, h, h)
    return out[:, :c]


def auto_shifts_aug_reference(x, mean, var, key, pad, act=False):
    """Pure-JAX f32 reference of the same separable reformulation (sanity check)."""
    wy, wxt = _prepare(x, mean, var, key, pad, act, jnp.float32)
    out = jnp.einsum(
        "nip,ncpq,nqj->ncij",
        wy, x.astype(jnp.float32), wxt,
        precision=jax.lax.Precision.HIGHEST)
    return out.astype(x.dtype)


if __name__ == "__main__":
    key = jax.random.PRNGKey(0)
    kx, km, kv, ks = jax.random.split(key, 4)

    n, c, h, w = 2, 4, 16, 16
    pad = 4  # module __init__(pad)

    x = jax.random.normal(kx, (n, c, h, w), dtype=jnp.float32)
    mean = jnp.abs(jax.random.normal(km, (2,), dtype=jnp.float32)) * 0.1
    var = jnp.abs(jax.random.normal(kv, (2,), dtype=jnp.float32)) * 0.05

    # Stochastic branch (act=False): rsample + clamp + per-sample noise.
    out_train = jax.block_until_ready(auto_shifts_aug(x, mean, var, ks, pad, act=False))
    # Deterministic branch (act=True): shift = clamped dist.mean.
    out_eval = jax.block_until_ready(auto_shifts_aug(x, mean, var, ks, pad, act=True))

    assert out_train.shape == (n, c, h, h) and out_train.dtype == x.dtype
    assert out_eval.shape == (n, c, h, h)
    assert bool(jnp.all(jnp.isfinite(out_train))) and bool(jnp.all(jnp.isfinite(out_eval)))

    # Sanity-check the Pallas path (pad-free fused taps, bf16 operands, stacked
    # matmuls, lane-dense repack) against an f32 XLA einsum of the identical
    # reformulation (same RNG key).
    ref_train = auto_shifts_aug_reference(x, mean, var, ks, pad, act=False)
    ref_eval = auto_shifts_aug_reference(x, mean, var, ks, pad, act=True)
    assert bool(jnp.allclose(out_train, ref_train, atol=5e-2, rtol=5e-2))
    assert bool(jnp.allclose(out_eval, ref_eval, atol=5e-2, rtol=5e-2))

    print("KERNEL_OK")
</pallas_src>

<mosaic_0001>
module attributes {stable_mosaic.version = 11 : i64} {
  func.func @_grid_sample_kernel(%arg0: i32, %arg1: i32, %arg2: memref<1x4x16x16xbf16, #tpu.memory_space<vmem>>, %arg3: memref<1x16x16xbf16, #tpu.memory_space<vmem>>, %arg4: memref<1x16x16xbf16, #tpu.memory_space<vmem>>, %arg5: memref<1x1x16x64xf32, #tpu.memory_space<vmem>>) attributes {dimension_semantics = [#tpu.dimension_semantics<parallel>, #tpu.dimension_semantics<parallel>], iteration_bounds = array<i64: 2, 1>, scalar_prefetch = 0 : i64, scratch_operands = 0 : i64, tpu.core_type = #tpu.core_type<tc>, window_params = [{transform_indices = @transform_0, window_bounds = array<i64: 1, 4, 16, 16>}, {transform_indices = @transform_1, window_bounds = array<i64: 1, 16, 16>}, {transform_indices = @transform_2, window_bounds = array<i64: 1, 16, 16>}, {transform_indices = @transform_3, window_bounds = array<i64: 1, 1, 16, 64>}]} {
    %c0 = arith.constant 0 : index
    %c0_0 = arith.constant 0 : index
    %c0_1 = arith.constant 0 : index
    %c0_2 = arith.constant 0 : index
    %0 = vector.load %arg2[%c0, %c0_0, %c0_1, %c0_2] : memref<1x4x16x16xbf16, #tpu.memory_space<vmem>>, vector<1x4x16x16xbf16>
    %1 = vector.shape_cast %0 : vector<1x4x16x16xbf16> to vector<4x16x16xbf16>
    %2 = vector.shape_cast %1 : vector<4x16x16xbf16> to vector<64x16xbf16>
    %c0_3 = arith.constant 0 : index
    %c0_4 = arith.constant 0 : index
    %c0_5 = arith.constant 0 : index
    %3 = vector.load %arg4[%c0_3, %c0_4, %c0_5] : memref<1x16x16xbf16, #tpu.memory_space<vmem>>, vector<1x16x16xbf16>
    %4 = vector.shape_cast %3 : vector<1x16x16xbf16> to vector<16x16xbf16>
    %cst = arith.constant dense<0.000000e+00> : vector<64x16xf32>
    %5 = tpu.matmul %2, %4, %cst {dimension_numbers = #tpu.dot_dimension_numbers<[1], [0], [0], [1], [0, 0, 1, 1], [], []>} : vector<64x16xbf16>, vector<16x16xbf16>, vector<64x16xf32> -> vector<64x16xf32>
    %6 = arith.truncf %5 : vector<64x16xf32> to vector<64x16xbf16>
    %7 = vector.shape_cast %6 : vector<64x16xbf16> to vector<4x16x16xbf16>
    %8 = tpu.transpose %7, [1, 0, 2] : vector<4x16x16xbf16> -> vector<16x4x16xbf16>
    %9 = vector.shape_cast %8 : vector<16x4x16xbf16> to vector<16x64xbf16>
    %c0_6 = arith.constant 0 : index
    %c0_7 = arith.constant 0 : index
    %c0_8 = arith.constant 0 : index
    %10 = vector.load %arg3[%c0_6, %c0_7, %c0_8] : memref<1x16x16xbf16, #tpu.memory_space<vmem>>, vector<1x16x16xbf16>
    %11 = vector.shape_cast %10 : vector<1x16x16xbf16> to vector<16x16xbf16>
    %cst_9 = arith.constant dense<0.000000e+00> : vector<16x64xf32>
    %12 = tpu.matmul %11, %9, %cst_9 {dimension_numbers = #tpu.dot_dimension_numbers<[1], [0], [0], [1], [0, 0, 1, 1], [], []>} : vector<16x16xbf16>, vector<16x64xbf16>, vector<16x64xf32> -> vector<16x64xf32>
    %c0_10 = arith.constant 0 : index
    %c0_11 = arith.constant 0 : index
    %c0_12 = arith.constant 0 : index
    %c0_13 = arith.constant 0 : index
    %13 = vector.load %arg5[%c0_10, %c0_11, %c0_12, %c0_13] : memref<1x1x16x64xf32, #tpu.memory_space<vmem>>, vector<1x1x16x64xf32>
    %14 = vector.shape_cast %13 : vector<1x1x16x64xf32> to vector<16x64xf32>
    %15 = vector.shape_cast %12 : vector<16x64xf32> to vector<1x1x16x64xf32>
    tpu.vector_store %arg5[%c0_10, %c0_11, %c0_12, %c0_13], %15 {strides = array<i32>} : memref<1x1x16x64xf32, #tpu.memory_space<vmem>>, vector<1x1x16x64xf32>,
    return
  }
  func.func @transform_0(%arg0: i32, %arg1: i32) -> (i32, i32, i32, i32) {
    %c0_i32 = arith.constant 0 : i32
    %c0_i32_0 = arith.constant 0 : i32
    %c0_i32_1 = arith.constant 0 : i32
    return %arg0, %arg1, %c0_i32, %c0_i32_0 : i32, i32, i32, i32
  }
  func.func @transform_1(%arg0: i32, %arg1: i32) -> (i32, i32, i32) {
    %c0_i32 = arith.constant 0 : i32
    %c0_i32_0 = arith.constant 0 : i32
    %c0_i32_1 = arith.constant 0 : i32
    return %arg0, %c0_i32, %c0_i32_0 : i32, i32, i32
  }
  func.func @transform_2(%arg0: i32, %arg1: i32) -> (i32, i32, i32) {
    %c0_i32 = arith.constant 0 : i32
    %c0_i32_0 = arith.constant 0 : i32
    %c0_i32_1 = arith.constant 0 : i32
    return %arg0, %c0_i32, %c0_i32_0 : i32, i32, i32
  }
  func.func @transform_3(%arg0: i32, %arg1: i32) -> (i32, i32, i32, i32) {
    %c0_i32 = arith.constant 0 : i32
    %c0_i32_0 = arith.constant 0 : i32
    %c0_i32_1 = arith.constant 0 : i32
    return %arg0, %arg1, %c0_i32, %c0_i32_0 : i32, i32, i32, i32
  }
}

</mosaic_0001>

<bundles_post_ra>
// kernel: tpu_custom_call.1
= control target key start
LH: loop header
LB: loop body
LE: loop exit
PB: predicated region body
PF: predicated region fallthrough
CT: control target
= control target key end

     0   :  { %s1540_s0 = inlined_call_operand.hbm [shape: bf16[2,4,16,16], index: 0, kind: input, shape index: {}]   ;;  %s1541_s1 = inlined_call_operand.hbm [shape: bf16[2,16,16], index: 1, kind: input, shape index: {}]   ;;  %s1542_s2 = inlined_call_operand.hbm [shape: bf16[2,16,16], index: 2, kind: input, shape index: {}]   ;;  %s1543_s3 = inlined_call_operand.hbm [shape: f32[2,1,16,64], index: 3, kind: output, shape index: {}]  }
   0x1   :  { %1550 = sst [smem:[#allocation15_spill]] %s1541_s1 }
   0x2   :  { %8 = vsyncpa [#allocation3], 0 }
   0x3   :  { %10 = vsyncpa [#allocation3 + $0x1], 0 }
   0x4   :  { %11 = vsyncpa [#allocation6], 0 }
   0x5   :  { %13 = vsyncpa [#allocation6 + $0x1], 0 }
   0x6   :  { %14 = vsyncpa [#allocation4], 0 }
   0x7   :  { %16 = vsyncpa [#allocation4 + $0x1], 0  ;;  %s1256_s12 = smov 0   ;;  %s1258_s13 = smov 0  }
   0x8   :  { %s1260_s14 = smov 0   ;;  %s1262_s15 = smov 0  }
   0x9   :  { %s1264_s16 = smov 0   ;;  %s1266_s17 = smov 0  }
   0xa LB: > { %1551 = sst [smem:[#allocation12_spill]] %s1206_s14  ;;  %s1287_s18 = sadd.s32 4294967295, %s1218_s17   ;;  %s1218_s17 = sphi %s1266_s17, %s22_s17   ;;  %s1214_s16 = sphi %s1264_s16, %s1574_s16   ;;  %s1210_s15 = sphi %s1262_s15, %s1573_s15   ;;  %s1206_s14 = sphi %s1260_s14, %s1569_s14   ;;  %s1202_s13 = sphi %s1258_s13, %s1572_s13   ;;  %s1198_s12 = sphi %s1256_s12, %s1571_s12  }
   0xb   : > { %s888_s19 = sadd.s32 4294967294, %s1218_s17   ;;  %s34_s20 = sadd.s32 1, %s1214_s16 }
   0xc   : > { %s43_s21 = sadd.s32 1, %s1206_s14  ;;  %p36_p0 = scmp.ge.s32.totalorder %s34_s20, 2 }
   0xd   : > { %p50_p1 = scmp.ne.s32.totalorder %s1206_s14, %s1202_s13  ;;  %p51_p2 = scmp.eq.s32.totalorder %s1218_s17, 0 }
   0xe   : > { %p56_p3 = scmp.ne.s32.totalorder %s1202_s13, %s1198_s12  ;;  %s1576_s20 = smov (%p36_p0, %s34_s20), 0 }
   0xf   : > { %1552 = sst [smem:[#allocation13_spill]] %s1576_s20  ;;  %p1299_p4 = por %p51_p2, %p50_p1 }
  0x10   : > { %p57_p5 = scmp.eq.s32.totalorder %s1287_s18, 0  ;;  %s38_s23 = ssub.s32 %s1214_s16, %s1576_s20 }
  0x11   : > { %p134_p6 = scmp.eq.s32.totalorder %s1287_s18, 1  ;;  %p41_p7 = scmp.eq.s32.totalorder %s38_s23, 0 }
  0x12   : > { %p1307_p8 = por %p57_p5, %p56_p3  ;;  %p140_p10 = scmp.eq.s32.totalorder %s888_s19, 1 }
  0x13   : > { %p1311_p9 = por %p134_p6, %p50_p1  ;;  %p974_p13 = scmp.lt.s32.totalorder %s1218_s17, 2 }
  0x14   : > { %s1554_s24 = scalar_select %p1307_p8, 1, 0 }
  0x15   : > { %s1555_s25 = scalar_select %p1311_p9, 1, 0 }
  0x16   : > { %s1316_s26 = scalar_select %p41_p7, %s1206_s14, %s43_s21  }
  0x17   : > { %p1318_p11 = por %p140_p10, %p56_p3  ;;  %s1325_s28 = sand.u32 1, %s1206_s14  }
  0x18   : > { %1556 = sst [smem:[#allocation14_spill]] %s1316_s26  ;;  %p1329_p0 = pnand %p974_p13, %p1299_p4 }
  0x19   : > { %s1557_s27 = scalar_select %p1318_p11, 1, 0 }
  0x1a   : > { %s184_s30 = sand.u32 1, %s1218_s17   ;;  %s894_s4 = sshll.u32 %s1325_s28, 3 }
  0x1b   : > { %s926_s5 = sshll.u32 %s1214_s16, 7  ;;  %s188_s6 = scalar_lea.vmem [#allocation5], %s894_s4 }
  0x1c   : > { %s195_s7 = sshll.u32 %s188_s6, 4  ;;  %s1559_s1 = sld [smem:[#allocation15_spill]]  ;;  %s1345_s7 = int_to_ptr.vmem [resolvable:$true] %s195_s7 }
  0x1d   : > { %s1347_s11 = scalar_lea.sflag [#allocation6], %s184_s30  ;;  %p1353_p2 = pneg %p1329_p0 }
  0x22   : > { %s1343_s10 = scalar_lea.hbm %s1559_s1, %s926_s5  ;;  %s1047_s6 = scalar_lea.hbm %s1559_s1, 256 }
  0x23   : > { %s1042_s19 = scalar_lea.hbm %s1343_s10, 128  ;;  %p1048_p5 = scmp.lt.u32.totalorder %s1343_s10, %s1559_s1 }
  0x24   : > { %p1043_p1 = scmp.ne.s32.totalorder %s1343_s10, %s1042_s19  ;;  %p1049_p6 = scmp.lt.u32.totalorder %s1047_s6, %s1042_s19 }
  0x25   : > { %p1051_p10 = scmp.lt.u32.totalorder %s1042_s19, %s1343_s10 }
  0x26   : > { %p1045_p3 = pnand %p1353_p2, %p1043_p1  ;;  %p1050_p7 = por %p1049_p6, %p1048_p5 }
  0x28   : > { %p1046_p4 = pneg %p1045_p3  ;;  %p1052_p13 = por %p1051_p10, %p1050_p7 }
  0x2a   : > { %p1053_p12 = pnand %p1052_p13, %p1046_p4 }
  0x2c   : > { %1056 = shalt.err (!%p1053_p12)
}
  0x2d   : > { %s1057_s30 = scalar_lea.vmem %s1345_s7, 128  ;;  %s1220_s22 = smov [#allocation5]  }
  0x2e   : > { %p1058_p1 = scmp.ne.s32.totalorder %s1345_s7, %s1057_s30  ;;  %s1062_s23 = sshll.u32 %s1220_s22, 4  ;;  %s1063_s23 = int_to_ptr.vmem [resolvable:$false] %s1062_s23 }
  0x2f   : > { %s1064_s8 = scalar_lea.vmem %s1063_s23, 256  ;;  %p1065_p9 = scmp.lt.s32.totalorder %s1345_s7, %s1063_s23 }
  0x30   : > { %p1060_p3 = pnand %p1058_p1, %p1353_p2  ;;  %p1066_p8 = scmp.lt.s32.totalorder %s1064_s8, %s1057_s30 }
  0x32   : > { %p1061_p11 = pneg %p1060_p3  ;;  %p1067_p5 = por %p1066_p8, %p1065_p9 }
  0x34   : > { %p1068_p6 = pnand %p1067_p5, %p1061_p11 }
  0x36   : > { %1071 = shalt.err (!%p1068_p6)
}
  0x37   : > { %s1548_s19 = smov 64   ;;  %s1222_s6 = smov 4  }
  0x38   : > { %966 = dma.hbm_to_vmem [thread:$0]  (!%p1329_p0), %s1343_s10, 128, %s1345_s7, %s1347_s11, %s1548_s19, %s1548_s19, %s1222_s6  }
  0x39   : > { %s1385_s22 = scalar_lea.hbm %s1542_s2, %s926_s5  ;;  %p900_p8 = scmp.ge.s32.totalorder %s1218_s17, 1 }
  0x3a   : > { %s209_s23 = scalar_lea.vmem [#allocation7], %s894_s4  ;;  %p224_p9 = scmp.lt.s32.totalorder %s1218_s17, 3 }
  0x3b   : > { %s216_s8 = sshll.u32 %s209_s23, 4  ;;  %s891_s20 = sshll.u32 %s1325_s28, 5  ;;  %s1402_s8 = int_to_ptr.vmem [resolvable:$true] %s216_s8 }
  0x3c   : > { %p1391_p11 = pnand %p900_p8, %p224_p9  ;;  %s925_s26 = sshll.u32 %s1214_s16, 9 }
  0x3d   : > { %s1400_s10 = scalar_lea.hbm %s1540_s0, %s925_s26  ;;  %s164_s4 = scalar_lea.vmem [#allocation2], %s891_s20 }
  0x3e   : > { %s1561_s1 = scalar_select %p1391_p11, 1, 0 }
  0x3f   : > { %s174_s5 = sshll.u32 %s164_s4, 4  ;;  %s161_s9 = scalar_lea.sflag [#allocation3], %s1325_s28  ;;  %s1404_s5 = int_to_ptr.vmem [resolvable:$true] %s174_s5 }
  0x40   : > { %s1072_s30 = scalar_lea.hbm %s1400_s10, 512  ;;  %s1077_s26 = scalar_lea.hbm %s1540_s0, 1024 }
  0x41   : > { %p1073_p12 = scmp.ne.s32.totalorder %s1400_s10, %s1072_s30  ;;  %p1078_p10 = scmp.lt.u32.totalorder %s1400_s10, %s1540_s0 }
  0x42   : > { %p1079_p13 = scmp.lt.u32.totalorder %s1077_s26, %s1072_s30  ;;  %p1081_p3 = scmp.lt.u32.totalorder %s1072_s30, %s1400_s10 }
  0x43   : > { %p1075_p4 = pnand %p1073_p12, %p1353_p2 }
  0x44   : > { %p1080_p1 = por %p1079_p13, %p1078_p10 }
  0x45   : > { %p1076_p7 = pneg %p1075_p4 }
  0x46   : > { %p1082_p5 = por %p1081_p3, %p1080_p1 }
  0x48   : > { %p1083_p6 = pnand %p1082_p5, %p1076_p7 }
  0x4a   : > { %1086 = shalt.err (!%p1083_p6)
}
  0x4b   : > { %s1087_s20 = scalar_lea.vmem %s1404_s5, 512  ;;  %s1223_s4 = smov [#allocation2]  }
  0x4c   : > { %p1088_p8 = scmp.ne.s32.totalorder %s1404_s5, %s1087_s20  ;;  %s1092_s23 = sshll.u32 %s1223_s4, 4  ;;  %s1093_s23 = int_to_ptr.vmem [resolvable:$false] %s1092_s23 }
  0x4d   : > { %s1094_s19 = scalar_lea.vmem %s1093_s23, 1024  ;;  %p1095_p4 = scmp.lt.s32.totalorder %s1404_s5, %s1093_s23 }
  0x4e   : > { %p1090_p9 = pnand %p1088_p8, %p1353_p2  ;;  %p1096_p11 = scmp.lt.s32.totalorder %s1094_s19, %s1087_s20 }
  0x50   : > { %p1091_p12 = pneg %p1090_p9  ;;  %p1097_p10 = por %p1096_p11, %p1095_p4 }
  0x52   : > { %p1098_p13 = pnand %p1097_p10, %p1091_p12 }
  0x54   : > { %1101 = shalt.err (!%p1098_p13)
}
  0x55   : > { %s1562_s30 = smov 64   ;;  %s1102_s14 = scalar_lea.hbm %s1385_s22, 128 }
  0x56   : > { %963 = dma.hbm_to_vmem [thread:$0]  (!%p1329_p0), %s1400_s10, 512, %s1404_s5, %s161_s9, %s1562_s30, %s1562_s30, %s1222_s6  }
  0x57   : > { %p1103_p7 = scmp.ne.s32.totalorder %s1385_s22, %s1102_s14  ;;  %s1107_s20 = scalar_lea.hbm %s1542_s2, 256 }
  0x58   : > { %p1108_p3 = scmp.lt.u32.totalorder %s1385_s22, %s1542_s2  ;;  %p1109_p5 = scmp.lt.u32.totalorder %s1107_s20, %s1102_s14 }
  0x59   : > { %p1105_p11 = pnand %p1103_p7, %p1353_p2  ;;  %p1111_p8 = scmp.lt.u32.totalorder %s1102_s14, %s1385_s22 }
  0x5a   : > { %p1110_p6 = por %p1109_p5, %p1108_p3 }
  0x5b   : > { %p1106_p1 = pneg %p1105_p11 }
  0x5c   : > { %p1112_p9 = por %p1111_p8, %p1110_p6 }
  0x5e   : > { %p1113_p12 = pnand %p1112_p9, %p1106_p1 }
  0x60   : > { %1116 = shalt.err (!%p1113_p12)
}
  0x61   : > { %s1117_s28 = scalar_lea.vmem %s1402_s8, 128  ;;  %s1224_s10 = smov [#allocation7]  }
  0x62   : > { %p1118_p4 = scmp.ne.s32.totalorder %s1402_s8, %s1117_s28  ;;  %s1122_s5 = sshll.u32 %s1224_s10, 4  ;;  %s1123_s5 = int_to_ptr.vmem [resolvable:$false] %s1122_s5 }
  0x63   : > { %s1124_s9 = scalar_lea.vmem %s1123_s5, 256  ;;  %p1125_p7 = scmp.lt.s32.totalorder %s1402_s8, %s1123_s5 }
  0x64   : > { %p1120_p10 = pnand %p1118_p4, %p1353_p2  ;;  %p1126_p11 = scmp.lt.s32.totalorder %s1124_s9, %s1117_s28 }
  0x66   : > { %p1121_p13 = pneg %p1120_p10  ;;  %p1127_p3 = por %p1126_p11, %p1125_p7 }
  0x68   : > { %p1128_p5 = pnand %p1127_p3, %p1121_p13 }
  0x6a   : > { %1131 = shalt.err (!%p1128_p5)
}
  0x6b   : > { %969 = dma.hbm_to_vmem [thread:$0]  (!%p1329_p0), %s1385_s22, 128, %s1402_s8, %s1347_s11, %s1562_s30, %s1562_s30, %s1222_s6  }
  0x6c   : > { %p1563_p2 = scmp.ne.s32.totalorder %s1561_s1, 0 }
  0x6d   : > { %s1461_s21 = sand.u32 (!%p1563_p2), 1, %s1202_s13   ;;  %p1564_p1 = scmp.ne.s32.totalorder (!%p1563_p2), %s1554_s24, 0 }
  0x6e   : > { %228 = sbr.rel (%p1563_p2) target bundleno = 732 (0x2dc), region = 32  ;;  %s901_s19 = sshll.u32 (!%p1563_p2), %s1461_s21, 5 }
  0x6f   : > { %s231_s14 = scalar_lea.sflag (!%p1563_p2), [#allocation3], %s1461_s21  ;;  %s234_s26 = scalar_lea.vmem (!%p1563_p2), [#allocation2], %s901_s19 }
  0x75   : > { %1185 = dma.done.wait (%p1564_p1), %s231_s14, 512  }
  0x76   : > { %1187 = vsyncadd (%p1564_p1), %s231_s14, 4294966784  ;;  %s239_s29 = sand.u32 1, %s1287_s18   ;;  %s902_s1 = sshll.u32 %s1461_s21, 3 }
  0x77   : > { %s240_s11 = scalar_lea.sflag [#allocation6], %s239_s29  ;;  %s1471_s6 = scalar_lea.vmem [#allocation5], %s902_s1 }
  0x78   : > { %1189 = dma.done.wait (%p1564_p1), %s240_s11, 256  }
  0x79   : > { %1191 = vsyncadd (%p1564_p1), %s240_s11, 4294967040  ;;  %s252_s22 = scalar_lea.vmem [#allocation7], %s902_s1  ;;  %vm323_vm0 = vcmask 130048   ;;  %v1037_v1 = vld [vmem:[%s234_s26] sm:$0xff]   ;;  %v1038_v2 = vld [vmem:[%s234_s26 + $0x8] sm:$0xff]   ;;  %v431_v13 = vlaneseq  ;;  %v1227_v23 = vmov 0  }
  0x7a   : > { %v1036_v0 = vld [vmem:[%s252_s22] sm:$0xff]   ;;  %938 = vmatprep.mubr.msk.bf16.mxu0 %vm323_vm0, %v1037_v1  ;;  %v1225_v11 = vmov 1983009808   ;;  %v1226_v17 = vmov 1934713408   ;;  %v422_v24 = vpack.i.b16 %v1227_v23, %v1227_v23  ;;  %vm1229_vm1 = vmmov 0  }
  0x7b   : > { %936 = vmatprep.subr.bf16.mxu0 %v1036_v0  ;;  %v1039_v3 = vld [vmem:[%s234_s26 + $0x10] sm:$0xff]   ;;  %v1040_v4 = vld [vmem:[%s234_s26 + $0x18] sm:$0xff]   ;;  %v429_v12 = vunpack.c.l.s4 %v1225_v11  ;;  %v460_v18 = vunpack.c.l.s4 %v1226_v17  ;;  %v432_v21 = vshrl.u32 %v431_v13, 7  ;;  %s1230_s18 = smov 48   ;;  %s1231_s24 = smov 16   ;;  %vm680_vm2 = vcmask 261120  }
  0x7c   : > { %937 = vmatpush3.bf16.msra.mxu0 %v1036_v0  ;;  %s1232_s8 = smov 32   ;;  %vm683_vm3 = vcmask 392192   ;;  %s904_s30 = sshll.u32 %s1461_s21, 4  ;;  %vm738_vm4 = vcmask 523264  }
  0x7d   : > { %v430_v20 = vunpack.c.0.s8 %v429_v12  ;;  %v461_v29 = vunpack.c.0.s8 %v460_v18  ;;  %s284_s7 = scalar_lea.vmem [#allocation8], %s904_s30  ;;  %s928_s4 = sshll.u32 %s1210_s15, 8 }
  0x7e   : > { %s757_s20 = sshll.u32 %s284_s7, 4  ;;  %s1491_s10 = scalar_lea.hbm %s1543_s3, %s928_s4  ;;  %s1486_s20 = int_to_ptr.vmem [resolvable:$true] %s757_s20 }
  0x7f   : > { %939 = vmatmul.mubr.msk.bf16.vlgmr.msra.gmra.mrb[0].mxu0 %vm323_vm0, %v1038_v2  ;;  %v433_v30 = vsub.s32 %v430_v20, %v432_v21  ;;  %v464_v36 = vsub.s32 %v461_v29, %v432_v21  ;;  %s742_s5 = scalar_lea.sflag [#allocation4], %s1461_s21  ;;  %s1132_s9 = scalar_lea.vmem %s1486_s20, 256 }
  0x80   : > { %942 = vmatprep.mubr.msk.bf16.mxu0 %vm323_vm0, %v1039_v3  ;;  %p1133_p0 = scmp.ne.s32.totalorder %s1486_s20, %s1132_s9  ;;  %p1565_p6 = scmp.ne.s32.totalorder %s1555_s25, 0 }
  0x81   : > { %s1233_s15 = smov [#allocation8]  }
  0x82   : > { %p1134_p8 = pnand %p1133_p0, %p1565_p6  ;;  %s1136_s19 = sshll.u32 %s1233_s15, 4  ;;  %s1137_s19 = int_to_ptr.vmem [resolvable:$false] %s1136_s19 }
  0x83   : > { %s1138_s14 = scalar_lea.vmem %s1137_s19, 512  ;;  %p1139_p12 = scmp.lt.s32.totalorder %s1486_s20, %s1137_s19 }
  0x84   : > { %p1135_p9 = pneg %p1134_p8  ;;  %p1140_p4 = scmp.lt.s32.totalorder %s1138_s14, %s1132_s9 }
  0x86   : > { %p1141_p10 = por %p1140_p4, %p1139_p12 }
  0x87   : > { %943 = vmatmul.mubr.msk.bf16.gmra.mrb[4].mxu0 %vm323_vm0, %v1040_v4 }
  0x88   : > { %p1142_p13 = pnand %p1141_p10, %p1135_p9 }
 0x152   : > { %v940_v5 = vpop.f32.mrb[0].mxu0 }
 0x153   : > { %v370_v6 = vpop.f32.mrb[1].mxu0 }
 0x154   : > { %v941_v7 = vpop.f32.mrb[2].mxu0 }
 0x155   : > { %v402_v8 = vpack.c.bf16 %v941_v7, %v940_v5  ;;  %v373_v9 = vpop.f32.mrb[3].mxu0 }
 0x156   : > { %v401_v10 = vpack.c.bf16 %v373_v9, %v370_v6 }
 0x157   : > { %v410_v14 = vshrl.u32 %v402_v8, 16 }
 0x158   : > { %v407_v15 = vpack.i.b16 %v402_v8, %v401_v10  ;;  %v409_v16 = vshrl.u32 %v401_v10, 16 }
 0x15a   : > { %v411_v19 = vpack.i.b16 %v410_v14, %v409_v16  ;;  %v944_v22 = vpop.f32.mrb[4].mxu0  ;;  %v427_v32 = vcombine.high %v407_v15, %v422_v24  ;;  %v434_v37 = vrot.slane %v407_v15, %v433_v30 }
 0x15b   : > { %v386_v25 = vpop.f32.mrb[5].mxu0 }
 0x15c   : > { %v945_v26 = vpop.f32.mrb[6].mxu0  ;;  %v441_v41 = vrot.slane %v427_v32, %v433_v30  ;;  %v493_v42 = vcombine.high %v411_v19, %v422_v24  ;;  %v500_v47 = vrot.slane %v411_v19, %v433_v30 }
 0x15d   : > { %v404_v27 = vpack.c.bf16 %v945_v26, %v944_v22  ;;  %v389_v28 = vpop.f32.mrb[7].mxu0 }
 0x15e   : > { %v403_v31 = vpack.c.bf16 %v389_v28, %v386_v25  ;;  %v507_v53 = vrot.slane %v493_v42, %v433_v30 }
 0x15f   : > { %v418_v33 = vshrl.u32 %v404_v27, 16 }
 0x160   : > { %v415_v34 = vpack.i.b16 %v404_v27, %v403_v31  ;;  %v417_v35 = vshrl.u32 %v403_v31, 16  ;;  %v1228_v27 = vmov 0.0  }
 0x161   : > { %946 = vmatprep.subr.bf16.mxu1 %v1228_v27  ;;  %948 = vmatprep.mubr.msk.bf16.mxu1 %vm1229_vm1, %v1228_v27 }
 0x162   : > { %v419_v38 = vpack.i.b16 %v418_v33, %v417_v35  ;;  %v442_v39 = vcombine.high %v415_v34, %v422_v24  ;;  %v449_v40 = vrot.slane %v415_v34, %v433_v30 }
 0x164   : > { %v456_v43 = vrot.slane %v442_v39, %v433_v30  ;;  %v457_v44 = vcombine.low %v434_v37, %v449_v40  ;;  %v458_v45 = vcombine.high %v434_v37, %v449_v40  ;;  %v508_v46 = vcombine.high %v419_v38, %v422_v24 }
 0x165   : > { %v515_v48 = vrot.slane %v419_v38, %v433_v30 }
 0x166   : > { %v465_v49 = vrot.slane %v457_v44, %v464_v36  ;;  %v472_v50 = vrot.slane %v458_v45, %v464_v36  ;;  %v473_v51 = vcombine.low %v441_v41, %v456_v43  ;;  %v474_v52 = vcombine.high %v441_v41, %v456_v43  ;;  %v1041_v44 = vld [vmem:[%s1471_s6] sm:$0xff]  }
 0x167   : > { %v522_v54 = vrot.slane %v508_v46, %v433_v30  ;;  %v523_v55 = vcombine.low %v500_v47, %v515_v48  ;;  %v524_v56 = vcombine.high %v500_v47, %v515_v48 }
 0x168   : > { %v481_v57 = vrot.slane %v473_v51, %v464_v36  ;;  %v488_v58 = vrot.slane %v474_v52, %v464_v36  ;;  %v559_v59 = vcombine.low %v465_v49, %v472_v50  ;;  %v914_v60 = vcombine.high %v465_v49, %v472_v50 }
 0x169   : > { %v531_v61 = vrot.slane %v523_v55, %v464_v36  ;;  %v538_v62 = vrot.slane %v524_v56, %v464_v36  ;;  %v539_v63 = vcombine.low %v507_v53, %v522_v54  ;;  %v540_v0 = vcombine.high %v507_v53, %v522_v54 }
 0x16a   : > { %v575_v1 = vcombine.low %v481_v57, %v488_v58  ;;  %v915_v2 = vcombine.high %v481_v57, %v488_v58  ;;  %v566_v3 = vrot.slane %v559_v59, %v433_v30  ;;  %v574_v4 = vrot.slane %v914_v60, %v433_v30 }
 0x16b   : > { %v547_v5 = vrot.slane %v539_v63, %v464_v36  ;;  %v554_v6 = vrot.slane %v540_v0, %v464_v36  ;;  %v609_v7 = vcombine.low %v531_v61, %v538_v62  ;;  %v916_v8 = vcombine.high %v531_v61, %v538_v62 }
 0x16c   : > { %v582_v9 = vrot.slane %v575_v1, %v433_v30  ;;  %v590_v10 = vrot.slane %v915_v2, %v433_v30  ;;  %v591_v11 = vcombine.low %v566_v3, %v574_v4 }
 0x16d   : > { %v616_v12 = vrot.slane %v609_v7, %v433_v30  ;;  %v624_v13 = vrot.slane %v916_v8, %v433_v30  ;;  %v625_v14 = vcombine.low %v547_v5, %v554_v6  ;;  %v917_v15 = vcombine.high %v547_v5, %v554_v6 }
 0x16e   : > { %v599_v16 = vcombine.low %v582_v9, %v590_v10  ;;  %v598_v20 = vrot.slane %v591_v11, %v464_v36 }
 0x16f   : > { %v632_v17 = vrot.slane %v625_v14, %v433_v30  ;;  %v640_v18 = vrot.slane %v917_v15, %v433_v30  ;;  %v641_v19 = vcombine.low %v616_v12, %v624_v13 }
 0x170   : > { %v606_v21 = vrot.slane %v599_v16, %v464_v36 }
 0x171   : > { %v649_v22 = vcombine.low %v632_v17, %v640_v18  ;;  %v648_v25 = vrot.slane %v641_v19, %v464_v36 }
 0x172   : > { %v608_v23 = vcombine.high %v598_v20, %v606_v21  ;;  %v607_v24 = vcombine.low %v598_v20, %v606_v21 }
 0x173   : > { %v656_v26 = vrot.slane %v649_v22, %v464_v36 }
 0x174   : > { %v668_v31 = vshrl.u32 %v608_v23, 16  ;;  %v662_v32 = vshrl.u32 %v607_v24, 16 }
 0x175   : > { %v658_v28 = vcombine.high %v648_v25, %v656_v26  ;;  %v657_v29 = vcombine.low %v648_v25, %v656_v26 }
 0x177   : > { %v669_v33 = vshrl.u32 %v658_v28, 16  ;;  %v663_v34 = vshrl.u32 %v657_v29, 16  ;;  %v667_v35 = vpack.i.b16 %v658_v28, %v608_v23  ;;  %v661_v30 = vpack.i.b16 %v657_v29, %v607_v24 }
 0x179   : > { %v670_v37 = vpack.i.b16 %v669_v33, %v668_v31  ;;  %v664_v38 = vpack.i.b16 %v663_v34, %v662_v32 }
 0x17b   : > { %675 = vrot.lane.b32.xlu1 %v670_v37, %s1230_s18  ;;  %671 = vrot.lane.b32.xlu0 %v664_v38, %s1231_s24 }
 0x17f   : > { %673 = vrot.lane.b32.xlu0 %v667_v35, %s1232_s8 }
 0x1ed   : > { %v672_v36 = vpop.permute.xlu0 %671  ;;  %v676_v41 = vpop.permute.xlu1 %675 }
 0x1ee   : > { %v679_v39 = vsel %vm323_vm0, %v661_v30, %v672_v36 }
 0x1f1   : > { %v674_v40 = vpop.permute.xlu0 %673 }
 0x1f2   : > { %v682_v42 = vsel %vm680_vm2, %v679_v39, %v674_v40 }
 0x1f3   : > { %v685_v43 = vsel %vm683_vm3, %v682_v42, %v676_v41 }
 0x1f4   : > { %947 = vmatpush3.bf16.msra.mxu1 %v685_v43 }
 0x1f7   : > { %949 = vmatmul.mubr.msk.bf16.vlgmr.msra.gmra.mrb[0].mxu1 %vm323_vm0, %v1041_v44 }
 0x2ca   : > { %v731_v45 = vpop.f32.mrb[0].mxu1 }
 0x2cb   : > { %739 = vst.msk [vmem:[%s284_s7] sm:$0xff] %vm738_vm4, %v731_v45  ;;  %v950_v46 = vpop.f32.mrb[1].mxu1 }
 0x2cc   : > { %v734_v47 = vpop.f32.mrb[2].mxu1 }
 0x2cd   : > { %740 = vst.msk [vmem:[%s284_s7 + $0x8] sm:$0xff] %vm738_vm4, %v734_v47  ;;  %v951_v48 = vpop.f32.mrb[3].mxu1 }
 0x2ce   : > { %1145 = shalt.err (!%p1142_p13)
}
 0x2cf   : > { %s1146_s26 = scalar_lea.hbm %s1491_s10, 256  ;;  %s1150_s11 = scalar_lea.hbm %s1543_s3, 512 }
 0x2d0   : > { %p1147_p7 = scmp.ne.s32.totalorder %s1491_s10, %s1146_s26  ;;  %p1151_p5 = scmp.lt.u32.totalorder %s1491_s10, %s1543_s3 }
 0x2d1   : > { %p1152_p2 = scmp.lt.u32.totalorder %s1150_s11, %s1146_s26  ;;  %p1154_p0 = scmp.lt.u32.totalorder %s1146_s26, %s1491_s10 }
 0x2d2   : > { %p1148_p11 = pnand %p1147_p7, %p1565_p6 }
 0x2d3   : > { %p1153_p1 = por %p1152_p2, %p1151_p5 }
 0x2d4   : > { %p1149_p3 = pneg %p1148_p11 }
 0x2d5   : > { %p1155_p8 = por %p1154_p0, %p1153_p1 }
 0x2d7   : > { %p1156_p9 = pnand %p1155_p8, %p1149_p3 }
 0x2d9   : > { %1159 = shalt.err (!%p1156_p9)
}
 0x2da   : > { %s1234_s18 = smov 128   ;;  %s1235_s24 = smov 8  }
 0x2db   : > { %958 = dma.vmem_to_hbm [thread:$0]  (%p1565_p6), %s1486_s20, 256, %s1491_s10, %s742_s5, %s1234_s18, %s1234_s18, %s1235_s24  }
 0x2dc PF: > { %s772_s8 = sand.u32 1, %s1198_s12   ;;  %p1566_p12 = scmp.ne.s32.totalorder %s1557_s27, 0 }
 0x2dd   : > { %p1567_p4 = scmp.ge.s32.totalorder %s1218_s17, 2  ;;  %s773_s30 = scalar_lea.sflag [#allocation4], %s772_s8 }
 0x2df   : > { %p971_p10 = pnand %p1567_p4, %p1566_p12 }
 0x2e1   : > { %1193 = dma.done.wait (!%p971_p10), %s773_s30, 256  }
 0x2e2   : > { %1195 = vsyncadd (!%p971_p10), %s773_s30, 4294967040  ;;  %s22_s17 = sadd.s32 1, %s1218_s17   ;;  %s1568_s7 = sld [smem:[#allocation12_spill]] }
 0x2e3   : > { %p19_p13 = scmp.ge.s32.totalorder %s22_s17, 4   ;;  %s1569_s14 = sld [smem:[#allocation14_spill]] }
 0x2e4   : > { %s1570_s25 = sld [smem:[#allocation13_spill]]  ;;  %s1571_s12 = smov %s1202_s13 }
 0x2e5   : > { %s1573_s15 = smov %s1214_s16  ;;  %21 = sbr.rel (!%p19_p13) target bundleno = 10 (0xa), region = 101 }
 0x2e8   : > { %s1572_s13 = smov %s1568_s7 }
 0x2ea   : > { %s1574_s16 = smov %s1570_s25 }
 0x2ec   :  { %778 = vsyncpa [#allocation3], 1 }
 0x2ed   :  { %780 = vsyncpa [#allocation3 + $0x1], 1 }
 0x2ee   :  { %781 = vsyncpa [#allocation6], 1 }
 0x2ef   :  { %783 = vsyncpa [#allocation6 + $0x1], 1 }
 0x2f0   :  { %784 = vsyncpa [#allocation4], 1 }
 0x2f1   :  { %786 = vsyncpa [#allocation4 + $0x1], 1 }

</bundles_post_ra>
